<compile_context>
chip_gen: v7x
topology: tpu7x:2x2x1
jax: 0.10.0
libtpu: 0.0.40
codegen_flags: <defaults>
</compile_context>

<pallas_src>
import math

import jax
import jax.numpy as jnp
from jax import lax
from jax.experimental import pallas as pl
from jax.experimental.pallas import tpu as pltpu


def time_embedding_kernel(t_ref, freqs_ref, w1_ref, b1_ref, w2_ref, b2_ref, o_ref):
    """One batch-tile of the fused forward pass.

    t_ref    : (TB, 1)       f32   time steps (batch tile)
    freqs_ref: (1, dim)      f32   precomputed frequencies, doubled: [f, f]
    w1_ref   : (dim, 4*dim)  f32
    b1_ref   : (1, 4*dim)    f32
    w2_ref   : (4*dim, dim)  f32
    b2_ref   : (1, dim)      f32
    o_ref    : (TB, dim)     f32
    """
    dim = o_ref.shape[1]
    half = dim // 2

    # Full-width args; sin on the first half of lanes, cos on the second half.
    args = t_ref[...] * freqs_ref[...]                       # (TB, 1)*(1, dim) -> (TB, dim)
    col = lax.broadcasted_iota(jnp.int32, args.shape, dimension=1)
    emb = jnp.where(col < half, jnp.sin(args), jnp.cos(args))  # (TB, dim), no concat

    # MLP: Linear(dim, 4*dim) -> ReLU -> Linear(4*dim, dim)   (MXU matmuls)
    h = jnp.dot(emb, w1_ref[...], preferred_element_type=jnp.float32) + b1_ref[...]
    h = jnp.maximum(h, 0.0)
    out = jnp.dot(h, w2_ref[...], preferred_element_type=jnp.float32) + b2_ref[...]
    o_ref[...] = out.astype(o_ref.dtype)


def time_embedding(time, w1, b1, w2, b2, *, block_b=8):
    """time: (B,) f32 -> (B, dim) f32.

    Grid runs over batch tiles of `block_b` rows; all weights stay resident in
    VMEM across the grid (index_map returns the same block every step).
    """
    B = time.shape[0]
    dim = w1.shape[0]
    hidden = w1.shape[1]
    assert dim % 2 == 0 and dim >= 4, "dim must be even and >= 4 (scale uses half-1)"
    half = dim // 2

    # Input-independent frequency row, doubled for the sin/cos halves.  This is
    # a compile-time constant; XLA folds it to a literal.
    scale = -(math.log(10000.0) / (half - 1))
    k = jnp.arange(half, dtype=jnp.float32) * scale
    freqs_full = jnp.exp(jnp.concatenate([k, k]))[None, :]   # (1, dim)

    t2d = time.reshape(B, 1).astype(jnp.float32)
    # Pad batch up to a multiple of the batch tile (sublane-aligned, >= 8).
    b_pad = ((B + block_b - 1) // block_b) * block_b
    if b_pad != B:
        t2d = jnp.pad(t2d, ((0, b_pad - B), (0, 0)))
    grid = (b_pad // block_b,)

    out = pl.pallas_call(
        time_embedding_kernel,
        out_shape=jax.ShapeDtypeStruct((b_pad, dim), jnp.float32),
        grid_spec=pltpu.PrefetchScalarGridSpec(
            num_scalar_prefetch=0,
            grid=grid,
            in_specs=[
                pl.BlockSpec((block_b, 1), lambda i: (i, 0)),      # time tile
                pl.BlockSpec((1, dim), lambda i: (0, 0)),          # freqs (resident)
                pl.BlockSpec((dim, hidden), lambda i: (0, 0)),     # W1 (resident)
                pl.BlockSpec((1, hidden), lambda i: (0, 0)),       # b1 (resident)
                pl.BlockSpec((hidden, dim), lambda i: (0, 0)),     # W2 (resident)
                pl.BlockSpec((1, dim), lambda i: (0, 0)),          # b2 (resident)
            ],
            out_specs=pl.BlockSpec((block_b, dim), lambda i: (i, 0)),
        ),
        compiler_params=pltpu.CompilerParams(
            dimension_semantics=("parallel",)),                    # both TCs on v7x
    )(t2d, freqs_full, w1, b1.reshape(1, -1), w2, b2.reshape(1, -1))
    return out[:B]


def init_params(key, dim):
    """Deterministic init matching nn.Linear shapes (stored transposed: (in, out))."""
    k1, k2, k3, k4 = jax.random.split(key, 4)
    hidden = dim * 4
    bound1 = 1.0 / math.sqrt(dim)
    bound2 = 1.0 / math.sqrt(hidden)
    w1 = jax.random.uniform(k1, (dim, hidden), jnp.float32, -bound1, bound1)
    b1 = jax.random.uniform(k2, (hidden,), jnp.float32, -bound1, bound1)
    w2 = jax.random.uniform(k3, (hidden, dim), jnp.float32, -bound2, bound2)
    b2 = jax.random.uniform(k4, (dim,), jnp.float32, -bound2, bound2)
    return w1, b1, w2, b2


def reference(time, w1, b1, w2, b2):
    """Plain-JAX reference mirroring the PyTorch forward."""
    dim = w1.shape[0]
    half = dim // 2
    freqs = jnp.exp(jnp.arange(half, dtype=jnp.float32) * -(math.log(10000.0) / (half - 1)))
    emb = time[:, None] * freqs[None, :]
    emb = jnp.concatenate([jnp.sin(emb), jnp.cos(emb)], axis=-1)
    h = jnp.maximum(emb @ w1 + b1, 0.0)
    return h @ w2 + b2


if __name__ == "__main__":
    dim = 32          # embedding dim (half_dim = 16), hidden = 128 lanes
    batch = 16        # 2 batch tiles of 8 -> exercises the parallel grid

    key = jax.random.PRNGKey(0)
    k_t, k_p = jax.random.split(key)
    # time steps: small positive integers, as in a diffusion sampler
    time = jax.random.randint(k_t, (batch,), 0, 1000).astype(jnp.float32)
    w1, b1, w2, b2 = init_params(k_p, dim)

    out = time_embedding(time, w1, b1, w2, b2)
    out = jax.block_until_ready(out)

    ref = reference(time, w1, b1, w2, b2)
    assert out.shape == (batch, dim), out.shape
    assert jnp.allclose(out, ref, atol=1e-4, rtol=1e-4), float(jnp.max(jnp.abs(out - ref)))

    print("KERNEL_OK")
</pallas_src>

<mosaic_0001>
module attributes {stable_mosaic.version = 11 : i64} {
  func.func @time_embedding_kernel(%arg0: i32, %arg1: memref<8x1xf32, #tpu.memory_space<vmem>>, %arg2: memref<1x32xf32, #tpu.memory_space<vmem>>, %arg3: memref<32x128xf32, #tpu.memory_space<vmem>>, %arg4: memref<1x128xf32, #tpu.memory_space<vmem>>, %arg5: memref<128x32xf32, #tpu.memory_space<vmem>>, %arg6: memref<1x32xf32, #tpu.memory_space<vmem>>, %arg7: memref<8x32xf32, #tpu.memory_space<vmem>>) attributes {dimension_semantics = [#tpu.dimension_semantics<parallel>], iteration_bounds = array<i64: 2>, scalar_prefetch = 0 : i64, scratch_operands = 0 : i64, tpu.core_type = #tpu.core_type<tc>, window_params = [{transform_indices = @transform_0, window_bounds = array<i64: 8, 1>}, {pipeline_mode = #tpu.pipeline_mode<synchronous>, transform_indices = @transform_1, window_bounds = array<i64: 1, 32>}, {pipeline_mode = #tpu.pipeline_mode<synchronous>, transform_indices = @transform_2, window_bounds = array<i64: 32, 128>}, {pipeline_mode = #tpu.pipeline_mode<synchronous>, transform_indices = @transform_3, window_bounds = array<i64: 1, 128>}, {pipeline_mode = #tpu.pipeline_mode<synchronous>, transform_indices = @transform_4, window_bounds = array<i64: 128, 32>}, {pipeline_mode = #tpu.pipeline_mode<synchronous>, transform_indices = @transform_5, window_bounds = array<i64: 1, 32>}, {transform_indices = @transform_6, window_bounds = array<i64: 8, 32>}]} {
    %c0 = arith.constant 0 : index
    %c0_0 = arith.constant 0 : index
    %0 = vector.load %arg1[%c0, %c0_0] : memref<8x1xf32, #tpu.memory_space<vmem>>, vector<8x1xf32>
    %c0_1 = arith.constant 0 : index
    %c0_2 = arith.constant 0 : index
    %1 = vector.load %arg2[%c0_1, %c0_2] : memref<1x32xf32, #tpu.memory_space<vmem>>, vector<1x32xf32>
    %2 = vector.broadcast %0 : vector<8x1xf32> to vector<8x32xf32>
    %3 = vector.broadcast %1 : vector<1x32xf32> to vector<8x32xf32>
    %4 = arith.mulf %2, %3 : vector<8x32xf32>
    %5 = tpu.iota {dimensions = array<i32: 1>} : vector<8x32xi32>
    %c16_i32 = arith.constant 16 : i32
    %6 = vector.broadcast %c16_i32 : i32 to vector<8x32xi32>
    %7 = arith.cmpi slt, %5, %6 : vector<8x32xi32>
    %8 = math.sin %4 : vector<8x32xf32>
    %9 = math.cos %4 : vector<8x32xf32>
    %10 = arith.select %7, %8, %9 : vector<8x32xi1>, vector<8x32xf32>
    %c0_3 = arith.constant 0 : index
    %c0_4 = arith.constant 0 : index
    %11 = vector.load %arg3[%c0_3, %c0_4] : memref<32x128xf32, #tpu.memory_space<vmem>>, vector<32x128xf32>
    %cst = arith.constant dense<0.000000e+00> : vector<8x128xf32>
    %12 = tpu.matmul %10, %11, %cst {dimension_numbers = #tpu.dot_dimension_numbers<[1], [0], [0], [1], [0, 0, 1, 1], [], []>} : vector<8x32xf32>, vector<32x128xf32>, vector<8x128xf32> -> vector<8x128xf32>
    %c0_5 = arith.constant 0 : index
    %c0_6 = arith.constant 0 : index
    %13 = vector.load %arg4[%c0_5, %c0_6] : memref<1x128xf32, #tpu.memory_space<vmem>>, vector<1x128xf32>
    %14 = vector.broadcast %13 : vector<1x128xf32> to vector<8x128xf32>
    %15 = arith.addf %12, %14 : vector<8x128xf32>
    %cst_7 = arith.constant 0.000000e+00 : f32
    %16 = vector.broadcast %cst_7 : f32 to vector<8x128xf32>
    %17 = arith.maximumf %15, %16 : vector<8x128xf32>
    %c0_8 = arith.constant 0 : index
    %c0_9 = arith.constant 0 : index
    %18 = vector.load %arg5[%c0_8, %c0_9] : memref<128x32xf32, #tpu.memory_space<vmem>>, vector<128x32xf32>
    %cst_10 = arith.constant dense<0.000000e+00> : vector<8x32xf32>
    %19 = tpu.matmul %17, %18, %cst_10 {dimension_numbers = #tpu.dot_dimension_numbers<[1], [0], [0], [1], [0, 0, 1, 1], [], []>} : vector<8x128xf32>, vector<128x32xf32>, vector<8x32xf32> -> vector<8x32xf32>
    %c0_11 = arith.constant 0 : index
    %c0_12 = arith.constant 0 : index
    %20 = vector.load %arg6[%c0_11, %c0_12] : memref<1x32xf32, #tpu.memory_space<vmem>>, vector<1x32xf32>
    %21 = vector.broadcast %20 : vector<1x32xf32> to vector<8x32xf32>
    %22 = arith.addf %19, %21 : vector<8x32xf32>
    %c0_13 = arith.constant 0 : index
    %c0_14 = arith.constant 0 : index
    %23 = vector.load %arg7[%c0_13, %c0_14] : memref<8x32xf32, #tpu.memory_space<vmem>>, vector<8x32xf32>
    tpu.vector_store %arg7[%c0_13, %c0_14], %22 {strides = array<i32>} : memref<8x32xf32, #tpu.memory_space<vmem>>, vector<8x32xf32>,
    return
  }
  func.func @transform_0(%arg0: i32) -> (i32, i32) {
    %c0_i32 = arith.constant 0 : i32
    %c0_i32_0 = arith.constant 0 : i32
    return %arg0, %c0_i32 : i32, i32
  }
  func.func @transform_1(%arg0: i32) -> (i32, i32) {
    %c0_i32 = arith.constant 0 : i32
    %c0_i32_0 = arith.constant 0 : i32
    %c0_i32_1 = arith.constant 0 : i32
    return %c0_i32, %c0_i32_0 : i32, i32
  }
  func.func @transform_2(%arg0: i32) -> (i32, i32) {
    %c0_i32 = arith.constant 0 : i32
    %c0_i32_0 = arith.constant 0 : i32
    %c0_i32_1 = arith.constant 0 : i32
    return %c0_i32, %c0_i32_0 : i32, i32
  }
  func.func @transform_3(%arg0: i32) -> (i32, i32) {
    %c0_i32 = arith.constant 0 : i32
    %c0_i32_0 = arith.constant 0 : i32
    %c0_i32_1 = arith.constant 0 : i32
    return %c0_i32, %c0_i32_0 : i32, i32
  }
  func.func @transform_4(%arg0: i32) -> (i32, i32) {
    %c0_i32 = arith.constant 0 : i32
    %c0_i32_0 = arith.constant 0 : i32
    %c0_i32_1 = arith.constant 0 : i32
    return %c0_i32, %c0_i32_0 : i32, i32
  }
  func.func @transform_5(%arg0: i32) -> (i32, i32) {
    %c0_i32 = arith.constant 0 : i32
    %c0_i32_0 = arith.constant 0 : i32
    %c0_i32_1 = arith.constant 0 : i32
    return %c0_i32, %c0_i32_0 : i32, i32
  }
  func.func @transform_6(%arg0: i32) -> (i32, i32) {
    %c0_i32 = arith.constant 0 : i32
    %c0_i32_0 = arith.constant 0 : i32
    return %arg0, %c0_i32 : i32, i32
  }
}

</mosaic_0001>

<bundles_post_ra>
// kernel: tpu_custom_call.1
= control target key start
LH: loop header
LB: loop body
LE: loop exit
PB: predicated region body
PF: predicated region fallthrough
CT: control target
= control target key end

     0   :  { %11 = vsyncpa [#allocation3], 0  ;;  %s1206_s0 = inlined_call_operand.vmem [shape: f32[16,1], index: 0, kind: input, shape index: {}]   ;;  %s1207_s1 = inlined_call_operand.vmem [shape: f32[1,32], index: 1, kind: input, shape index: {}]   ;;  %s1208_s2 = inlined_call_operand.vmem [shape: f32[32,128], index: 2, kind: input, shape index: {}]   ;;  %s1209_s3 = inlined_call_operand.vmem [shape: f32[1,128], index: 3, kind: input, shape index: {}]   ;;  %s1210_s4 = inlined_call_operand.vmem [shape: f32[128,32], index: 4, kind: input, shape index: {}]   ;;  %s1211_s5 = inlined_call_operand.vmem [shape: f32[1,32], index: 5, kind: input, shape index: {}]   ;;  %s1212_s6 = inlined_call_operand.hbm [shape: f32[16,32], index: 6, kind: output, shape index: {}]  }
   0x1   :  { %13 = vsyncpa [#allocation3 + $0x1], 0  ;;  %s1013_s21 = smov 0   ;;  %s1015_s22 = smov 0  }
   0x2   :  { %s1017_s23 = smov 0   ;;  %s1019_s24 = smov 0  }
   0x3 LB: > { %s1034_s25 = sadd.s32 4294967295, %s965_s24   ;;  %s725_s26 = sadd.s32 4294967294, %s965_s24   ;;  %s965_s24 = sphi %s1019_s24, %s1218_s24   ;;  %s961_s23 = sphi %s1017_s23, %s1217_s23   ;;  %s957_s22 = sphi %s1015_s22, %s1216_s22   ;;  %s953_s21 = sphi %s1013_s21, %s1215_s21  }
   0x4   : > { %s1038_s27 = sadd.s32 1, %s965_s24   ;;  %s157_s28 = sadd.s32 1, %s961_s23 }
   0x5   : > { %s154_s29 = ssub.s32 %s965_s24, %s1038_s27  ;;  %p167_p0 = scmp.ne.s32.totalorder %s961_s23, %s957_s22 }
   0x6   : > { %p155_p1 = scmp.eq.s32.totalorder %s154_s29, 0  ;;  %p168_p2 = scmp.eq.s32.totalorder %s1034_s25, 1 }
   0x7   : > { %p173_p3 = scmp.ne.s32.totalorder %s957_s22, %s953_s21  ;;  %p174_p4 = scmp.eq.s32.totalorder %s725_s26, 1 }
   0x8   : > { %s1049_s30 = scalar_select %p155_p1, %s961_s23, %s157_s28  }
   0x9   : > { %p1051_p5 = por %p168_p2, %p167_p0  ;;  %p1055_p6 = por %p174_p4, %p173_p3 }
   0xa   : > { %p728_p7 = scmp.ge.s32.totalorder %s965_s24, 1  ;;  %p214_p8 = scmp.lt.s32.totalorder %s965_s24, 3 }
   0xc   : > { %p215_p9 = pnand %p728_p7, %p214_p8 }
   0xd   : > { %p243_p10 = scmp.lt.s32.totalorder (!%p215_p9), %s1034_s25, 1  ;;  %v967_v0 = vmov (!%p215_p9), 0   ;;  %v472_v2 = vld [vmem:[%s1208_s2] sm:$0xff] (!%p215_p9)  ;;  %v473_v3 = vld [vmem:[%s1208_s2 + $0x8] sm:$0xff] (!%p215_p9)  ;;  %v474_v4 = vld [vmem:[%s1208_s2 + $0x10] sm:$0xff] (!%p215_p9)  ;;  %v968_v5 = vmov (!%p215_p9), 0.0|0.0  }
   0xe   : > { %218 = sbr.rel (%p215_p9) target bundleno = 680 (0x2a8), region = 44  ;;  %898 = vset.pattern.permute.xlu0 (!%p215_p9), %v967_v0  ;;  %815 = vmatprep.subr.bf16.mxu0 (!%p215_p9), %v968_v5  ;;  %v816_v6 = vpack.c.bf16 (!%p215_p9), %v473_v3, %v472_v2  ;;  %v475_v7 = vld [vmem:[%s1208_s2 + $0x18] sm:$0xff] (!%p215_p9)  ;;  %vm969_vm0 = vmmov (!%p215_p9), 0   ;;  %v970_v8 = vmov (!%p215_p9), 0.0   ;;  %v558_v10 = vld [vmem:[%s1210_s4] sm:$0xff] (!%p215_p9)  ;;  %v559_v11 = vld [vmem:[%s1210_s4 + $0x8] sm:$0xff] (!%p215_p9) }
   0xf   : > { %777 = vmatprep.mubr.msk.f32.mxu0 (!%p215_p9), %vm969_vm0, %v970_v8  ;;  %821 = vmatprep.subr.bf16.mxu1 (!%p215_p9), %v968_v5  ;;  %v819_v9 = vpack.c.bf16 (!%p215_p9), %v475_v7, %v474_v4  ;;  %v560_v12 = vld [vmem:[%s1210_s4 + $0x10] sm:$0xff] (!%p215_p9)  ;;  %v822_v13 = vpack.c.bf16 (!%p215_p9), %v559_v11, %v558_v10  ;;  %v561_v14 = vld [vmem:[%s1210_s4 + $0x18] sm:$0xff] (!%p215_p9)  ;;  %v562_v16 = vld [vmem:[%s1210_s4 + $0x20] sm:$0xff] (!%p215_p9)  ;;  %v971_v44 = vmov (!%p215_p9), 683565275   ;;  %s744_s17 = sshll.u32 (!%p215_p9), %s1034_s25, 7 }
  0x10   : > { %812 = vmatprep.mubr.msk.f32.mxu1 (!%p215_p9), %vm969_vm0, %v970_v8  ;;  %817 = vmatpush3.bf16.msra.mxu0 (!%p215_p9), %v816_v6  ;;  %v825_v15 = vpack.c.bf16 (!%p215_p9), %v561_v14, %v560_v12  ;;  %v563_v17 = vld [vmem:[%s1210_s4 + $0x28] sm:$0xff] (!%p215_p9)  ;;  %v564_v19 = vld [vmem:[%s1210_s4 + $0x30] sm:$0xff] (!%p215_p9)  ;;  %v565_v20 = vld [vmem:[%s1210_s4 + $0x38] sm:$0xff] (!%p215_p9)  ;;  %v972_v46 = vmov (!%p215_p9), 2475754826   ;;  %s1163_s28 = scalar_lea.hbm (!%p215_p9), %s1212_s6, %s744_s17 }
  0x11   : > { %818 = vmatprep.subr.bf16.mxu0 (!%p215_p9), %v968_v5  ;;  %823 = vmatpush3.bf16.msra.mxu1 (!%p215_p9), %v822_v13  ;;  %v828_v18 = vpack.c.bf16 (!%p215_p9), %v563_v17, %v562_v16  ;;  %v831_v21 = vpack.c.bf16 (!%p215_p9), %v565_v20, %v564_v19  ;;  %v566_v22 = vld [vmem:[%s1210_s4 + $0x40] sm:$0xff] (!%p215_p9)  ;;  %v567_v23 = vld [vmem:[%s1210_s4 + $0x48] sm:$0xff] (!%p215_p9)  ;;  %v568_v25 = vld [vmem:[%s1210_s4 + $0x50] sm:$0xff] (!%p215_p9)  ;;  %v973_v49 = vmov (!%p215_p9), 2131351028  }
  0x12   : > { %824 = vmatprep.subr.bf16.mxu1 (!%p215_p9), %v968_v5  ;;  %v834_v24 = vpack.c.bf16 (!%p215_p9), %v567_v23, %v566_v22  ;;  %v569_v26 = vld [vmem:[%s1210_s4 + $0x58] sm:$0xff] (!%p215_p9)  ;;  %v570_v28 = vld [vmem:[%s1210_s4 + $0x60] sm:$0xff] (!%p215_p9)  ;;  %v571_v29 = vld [vmem:[%s1210_s4 + $0x68] sm:$0xff] (!%p215_p9)  ;;  %v974_v52 = vmov (!%p215_p9), 2102212464  }
  0x13   : > { %v837_v27 = vpack.c.bf16 (!%p215_p9), %v569_v26, %v568_v25  ;;  %v840_v30 = vpack.c.bf16 (!%p215_p9), %v571_v29, %v570_v28  ;;  %v731_v31 = vld [vmem:[%s1207_s1] ss:$0 sm:$0xff] (!%p215_p9)  ;;  %v975_v55 = vmov (!%p215_p9), 920167782   ;;  %v976_v58 = vmov (!%p215_p9), 1326507024  }
  0x14   : > { %820 = vmatpush3.bf16.msra.mxu0 (!%p215_p9), %v819_v9 }
  0x15   : > { %s244_s9 = scalar_select %p243_p10, %s1034_s25, 1  ;;  %826 = vmatpush3.bf16.msra.mxu1 %v825_v15 }
  0x16   : > { %827 = vmatprep.subr.bf16.mxu1 %v968_v5  ;;  %s977_s25 = smov [#allocation2]  }
  0x17   : > { %s730_s10 = sshll.u32 %s244_s9, 3 }
  0x18   : > { %s246_s13 = scalar_lea.vmem %s1206_s0, %s730_s10  ;;  %s907_s10 = sshll.u32 %s977_s25, 4  ;;  %s908_s10 = int_to_ptr.vmem [resolvable:$false] %s907_s10 }
  0x19   : > { %v247_v1 = vld [vmem:[%s246_s13] sm:$0xff]  ;;  %829 = vmatpush3.bf16.msra.mxu1 %v828_v18  ;;  %s240_s13 = sand.u32 1, %s957_s22   ;;  %s909_s11 = scalar_lea.vmem %s908_s10, 256 }
  0x1a   : > { %251 = vperm.xlu0 %898, %v247_v1   ;;  %830 = vmatprep.subr.bf16.mxu1 %v968_v5  ;;  %s729_s14 = sshll.u32 %s240_s13, 3  ;;  %s653_s29 = scalar_lea.sflag [#allocation3], %s240_s13 }
  0x1b   : > { %s242_s18 = scalar_lea.vmem [#allocation2], %s729_s14 }
  0x1c   : > { %s666_s19 = sshll.u32 %s242_s18, 4  ;;  %s1165_s19 = int_to_ptr.vmem [resolvable:$true] %s666_s19 }
  0x1d   : > { %832 = vmatpush3.bf16.msra.mxu1 %v831_v21  ;;  %s903_s9 = scalar_lea.vmem %s1165_s19, 128  ;;  %p910_p0 = scmp.lt.s32.totalorder %s1165_s19, %s908_s10 }
  0x1e   : > { %833 = vmatprep.subr.bf16.mxu1 %v968_v5  ;;  %p904_p11 = scmp.ne.s32.totalorder %s1165_s19, %s903_s9  ;;  %p911_p1 = scmp.lt.s32.totalorder %s909_s11, %s903_s9 }
  0x20   : > { %p905_p12 = pnand %p904_p11, %p1051_p5  ;;  %p912_p2 = por %p911_p1, %p910_p0 }
  0x21   : > { %835 = vmatpush3.bf16.msra.mxu1 %v834_v24 }
  0x22   : > { %836 = vmatprep.subr.bf16.mxu1 %v968_v5  ;;  %p906_p13 = pneg %p905_p12 }
  0x24   : > { %p913_p3 = pnand %p912_p2, %p906_p13 }
  0x25   : > { %838 = vmatpush3.bf16.msra.mxu1 %v837_v27 }
  0x26   : > { %839 = vmatprep.subr.bf16.mxu1 %v968_v5 }
  0x29   : > { %841 = vmatpush3.bf16.msra.mxu1 %v840_v30 }
  0x2a   : > { %842 = vmatprep.subr.bf16.mxu1 %v968_v5 }
  0x99   : > { %v252_v32 = vpop.permute.xlu0 %251 }
  0x9a   : > { %v1123_v33 = vmul.f32 %v731_v31, %v252_v32 }
  0x9c   : > { %v267_v34 = vand.u32 2139095040, %v1123_v33  ;;  %v264_v38 = vand.u32 2147483647, %v1123_v33  ;;  %vm266_vm8 = vcmp.lt.s32.totalorder %v1123_v33, 0 }
  0x9e   : > { %v268_v35 = vshrl.u32 %v267_v34, 23  ;;  %v271_v41 = vand.u32 8388607, %v264_v38  ;;  %vm265_vm9 = vcmp.le.f32.partialorder %v264_v38, 0.7853982 }
  0xa0   : > { %v732_v36 = vadd.s32 4294967169, %v268_v35  ;;  %v272_v60 = vor.u32 8388608, %v271_v41 }
  0xa2   : > { %v274_v37 = vadd.s32 1, %v732_v36  ;;  %v312_v10 = vshll.u32 %v272_v60, 8 }
  0xa4   : > { %vm275_vm1 = vcmp.gt.s32.totalorder %v274_v37, 0 }
  0xa5   : > { %v276_v39 = vsel %vm275_vm1, %v274_v37, 0  ;;  %vm356_vm1 = vweird.f32 %v1123_v33 }
  0xa6   : > { %v278_v40 = vand.u32 31, %v276_v39  ;;  %v277_v43 = vshrl.u32 %v276_v39, 5 }
  0xa8   : > { %v279_v42 = vsub.s32 32, %v278_v40  ;;  %v281_v45 = vshll.u32 %v971_v44, %v278_v40  ;;  %v284_v47 = vshll.u32 %v972_v46, %v278_v40  ;;  %v287_v51 = vshll.u32 %v973_v49, %v278_v40 }
  0xa9   : > { %v290_v54 = vshll.u32 %v974_v52, %v278_v40  ;;  %v293_v57 = vshll.u32 %v975_v55, %v278_v40  ;;  %vm296_vm2 = vcmp.lt.s32.totalorder %v277_v43, 1  ;;  %vm299_vm3 = vcmp.lt.s32.totalorder %v277_v43, 4 }
  0xaa   : > { %v282_v48 = vshrl.u32 %v972_v46, %v279_v42  ;;  %v285_v50 = vshrl.u32 %v973_v49, %v279_v42  ;;  %v288_v53 = vshrl.u32 %v974_v52, %v279_v42  ;;  %v291_v56 = vshrl.u32 %v975_v55, %v279_v42 }
  0xab   : > { %v294_v59 = vshrl.u32 %v976_v58, %v279_v42  ;;  %v280_v5 = vshrl.u32 %v971_v44, %v279_v42  ;;  %vm298_vm4 = vcmp.lt.s32.totalorder %v277_v43, 3  ;;  %vm297_vm5 = vcmp.lt.s32.totalorder %v277_v43, 2 }
  0xac   : > { %v283_v61 = vor.u32 %v282_v48, %v281_v45  ;;  %v286_v62 = vor.u32 %v285_v50, %v284_v47  ;;  %v289_v63 = vor.u32 %v288_v53, %v287_v51  ;;  %v292_v0 = vor.u32 %v291_v56, %v290_v54 }
  0xad   : > { %v295_v1 = vor.u32 %v294_v59, %v293_v57  ;;  %v261_v53 = vlaneseq }
  0xae   : > { %v301_v2 = vsel %vm299_vm3, %v289_v63, 2102212464  ;;  %v304_v3 = vsel %vm296_vm2, %v283_v61, %v286_v62  ;;  %v308_v4 = vsel %vm296_vm2, %v286_v62, %v289_v63  ;;  %v305_v6 = vsel %vm299_vm3, %v292_v0, 920167782 }
  0xaf   : > { %v309_v7 = vsel %vm299_vm3, %v295_v1, 1326507024  ;;  %v306_v8 = vsel %vm298_vm4, %v289_v63, %v305_v6  ;;  %v300_v11 = vsel %vm296_vm2, %v280_v5, %v283_v61  ;;  %v302_v12 = vsel %vm298_vm4, %v286_v62, %v301_v2  ;;  %v572_v6 = vld [vmem:[%s1210_s4 + $0x70] sm:$0xff] }
  0xb0   : > { %v310_v9 = vsel %vm298_vm4, %v292_v0, %v309_v7  ;;  %v307_v13 = vsel %vm297_vm5, %v304_v3, %v306_v8  ;;  %v303_v19 = vsel %vm297_vm5, %v300_v11, %v302_v12  ;;  %v262_v55 = vand.u32 127, %v261_v53  ;;  %v573_v7 = vld [vmem:[%s1210_s4 + $0x78] sm:$0xff]  ;;  %v740_v8 = vld [vmem:[%s1209_s3] ss:$0 sm:$0xff] }
  0xb1   : > { %v311_v14 = vsel %vm297_vm5, %v308_v4, %v310_v9  ;;  %v1132_v17 = vmul.u32.u64.low %v312_v10, %v307_v13  ;;  %v1133_v18 = vmul.u32.u64.high %v312_v10, %v307_v13, %v1132_v17  ;;  %v319_v21 = vmul.u32 %v312_v10, %v303_v19  ;;  %v742_v13 = vld [vmem:[%s1211_s5] ss:$0 sm:$0xff] }
  0xb2   : > { %v1129_v15 = vmul.u32.u64.low %v312_v10, %v311_v14  ;;  %v1130_v16 = vmul.u32.u64.high %v312_v10, %v311_v14, %v1129_v15  ;;  %vm263_vm10 = vcmp.lt.s32.totalorder %v262_v55, 16  ;;  %vm483_vm2 = vcmask 261120  }
  0xb3   : > { %v322_v20 = vadd.s32 1, %v1133_v18 }
  0xb4   : > { %vm321_vm6 = vc.u32 %v1130_v16, %v1132_v17  ;;  %v320_v34 = vadd.s32 %v1132_v17, %v1130_v16 }
  0xb5   : > { %v323_v22 = vsel %vm321_vm6, %v322_v20, %v1133_v18 }
  0xb6   : > { %v324_v23 = vadd.s32 %v323_v22, %v319_v21 }
  0xb8   : > { %v325_v24 = vadd.s32 536870912, %v324_v23 }
  0xba   : > { %v326_v25 = vshrl.u32 %v325_v24, 30 }
  0xbc   : > { %v327_v26 = vshll.u32 %v326_v25, 30  ;;  %v350_v47 = vsub.s32 4, %v326_v25 }
  0xbe   : > { %v328_v27 = vsub.s32 %v324_v23, %v327_v26  ;;  %v351_v50 = vsel %vm266_vm8, %v350_v47, %v326_v25 }
  0xbf   : > { %v353_v52 = vsel %vm265_vm9, 0, %v351_v50 }
  0xc0   : > { %v330_v28 = vsub.s32 0, %v328_v27  ;;  %v357_v54 = vadd.s32 3, %v353_v52  ;;  %v461_v57 = vand.u32 3, %v353_v52 }
  0xc2   : > { %v733_v29 = vmin.u32 %v330_v28, %v328_v27  ;;  %v358_v56 = vand.u32 3, %v357_v54  ;;  %vm466_vm12 = vcmp.eq.s32.totalorder %v461_v57, 2  ;;  %vm463_vm14 = vcmp.eq.s32.totalorder %v461_v57, 0 }
  0xc3   : > { %vm462_vm0 = vcmp.lt.s32.totalorder %v461_v57, 2 }
  0xc4   : > { %v332_v30 = vclz %v733_v29  ;;  %vm363_vm11 = vcmp.eq.s32.totalorder %v358_v56, 2  ;;  %vm360_vm13 = vcmp.eq.s32.totalorder %v358_v56, 0  ;;  %vm359_vm15 = vcmp.lt.s32.totalorder %v358_v56, 2 }
  0xc6   : > { %v734_v31 = vadd.s32 4294967294, %v332_v30 }
  0xc8   : > { %vm735_vm7 = vcmp.lt.s32.totalorder %v734_v31, 0 }
  0xc9   : > { %v335_v32 = vsel %vm735_vm7, 0, %v734_v31 }
  0xca   : > { %v336_v35 = vsub.s32 32, %v335_v32  ;;  %v340_v36 = vsub.s32 4294967266, %v335_v32  ;;  %v337_v37 = vshll.u32 %v328_v27, %v335_v32 }
  0xcc   : > { %v338_v39 = vshrl.u32 %v320_v34, %v336_v35  ;;  %v341_v40 = vadd.s32 127, %v340_v36 }
  0xce   : > { %v339_v41 = vor.u32 %v338_v39, %v337_v37  ;;  %v342_v42 = vshll.u32 %v341_v40, 23 }
  0xd0   : > { %v343_v43 = vor.u32 4788187, %v342_v42  ;;  %v346_v45 = vcvt.s32.f32 %v339_v41 }
  0xd2   : > { %v344_v44 = vand.u32 2147483647, %v343_v43 }
  0xd4   : > { %v347_v46 = vmul.f32 %v346_v45, %v344_v44 }
  0xd6   : > { %v348_v48 = vxor.u32 2147483648, %v347_v46 }
  0xd8   : > { %v349_v49 = vsel %vm266_vm8, %v348_v48, %v347_v46 }
  0xd9   : > { %v352_v51 = vsel %vm265_vm9, %v1123_v33, %v349_v49  ;;  %v843_v33 = vpack.c.bf16 %v573_v7, %v572_v6 }
  0xda   : > { %899 = vcosq.f32 %v352_v51 }
  0xdb   : > { %901 = vsinq.f32 %v352_v51  ;;  %844 = vmatpush3.bf16.msra.mxu1 %v843_v33 }
  0xe4   : > { %v900_v58 = vpop.eup %899 }
  0xe5   : > { %v902_v59 = vpop.eup %901  ;;  %v364_v60 = vxor.u32 2147483648, %v900_v58 }
  0xe6   : > { %v361_v61 = vxor.u32 2147483648, %v902_v59 }
  0xe7   : > { %v365_v38 = vsel %vm363_vm11, %v364_v60, %v902_v59  ;;  %v468_v62 = vsel %vm466_vm12, %v364_v60, %v902_v59 }
  0xe8   : > { %v362_v63 = vsel %vm360_vm13, %v900_v58, %v361_v61  ;;  %v465_v0 = vsel %vm463_vm14, %v900_v58, %v361_v61 }
  0xe9   : > { %v366_v1 = vsel %vm359_vm15, %v362_v63, %v365_v38  ;;  %v469_v2 = vsel %vm462_vm0, %v465_v0, %v468_v62 }
  0xea   : > { %v367_v3 = vsel %vm356_vm1, nan, %v366_v1  ;;  %v470_v4 = vsel %vm356_vm1, nan, %v469_v2 }
  0xeb   : > { %v471_v5 = vsel %vm263_vm10, %v367_v3, %v470_v4 }
  0xec   : > { %778 = vmatmul.mubr.msk.f32.vlgmr.msra.gmra.mrb[0].mxu0 %vm483_vm2, %v471_v5 }
 0x1bf   : > { %v553_v9 = vpop.f32.mrb[0].mxu0 }
 0x1c0   : > { %v554_v10 = vadd.f32 %v740_v8, %v553_v9  ;;  %v779_v11 = vpop.f32.mrb[1].mxu0 }
 0x1c2   : > { %v557_v12 = vmax.f32 %v554_v10, 0.0 }
 0x1c4   : > { %813 = vmatmul.mubr.f32.vlgmr.msra.gmra.mrb[0].mxu1 %v557_v12 }
 0x297   : > { %v647_v14 = vpop.f32.mrb[0].mxu1 }
 0x298   : > { %v648_v15 = vadd.f32 %v742_v13, %v647_v14  ;;  %v814_v16 = vpop.f32.mrb[1].mxu1 }
 0x29a   : > { %651 = vst.msk [vmem:[%s242_s18] sm:$0xff] %vm483_vm2, %v648_v15 }
 0x29b   : > { %916 = shalt.err (!%p913_p3)
}
 0x29c   : > { %s917_s12 = scalar_lea.hbm %s1163_s28, 128  ;;  %s921_s15 = scalar_lea.hbm %s1212_s6, 256 }
 0x29d   : > { %p918_p4 = scmp.ne.s32.totalorder %s1163_s28, %s917_s12  ;;  %p922_p9 = scmp.lt.u32.totalorder %s1163_s28, %s1212_s6 }
 0x29e   : > { %p923_p10 = scmp.lt.u32.totalorder %s921_s15, %s917_s12  ;;  %p925_p12 = scmp.lt.u32.totalorder %s917_s12, %s1163_s28 }
 0x29f   : > { %p919_p7 = pnand %p918_p4, %p1051_p5 }
 0x2a0   : > { %p924_p11 = por %p923_p10, %p922_p9 }
 0x2a1   : > { %p920_p8 = pneg %p919_p7 }
 0x2a2   : > { %p926_p13 = por %p925_p12, %p924_p11 }
 0x2a4   : > { %p927_p0 = pnand %p926_p13, %p920_p8 }
 0x2a6   : > { %930 = shalt.err (!%p927_p0)
}
 0x2a7   : > { %849 = dma.vmem_to_hbm [thread:$0]  (%p1051_p5), %s1165_s19, 128, %s1163_s28, %s653_s29  }
 0x2a8 PF: > { %p855_p1 = scmp.ge.s32.totalorder %s965_s24, 2  ;;  %s678_s18 = sand.u32 1, %s953_s21  }
 0x2a9   : > { %s679_s20 = scalar_lea.sflag [#allocation3], %s678_s18 }
 0x2aa   : > { %p852_p2 = pnand %p855_p1, %p1055_p6 }
 0x2ac   : > { %948 = dma.done.wait (!%p852_p2), %s679_s20, 128  }
 0x2ad   : > { %950 = vsyncadd (!%p852_p2), %s679_s20, 4294967168  ;;  %p16_p3 = scmp.ge.s32.totalorder %s1038_s27, 4   ;;  %s1215_s21 = smov %s957_s22 }
 0x2ae   : > { %s1216_s22 = smov %s961_s23  ;;  %s1217_s23 = smov %s1049_s30 }
 0x2af   : > { %s1218_s24 = smov %s1038_s27  ;;  %18 = sbr.rel (!%p16_p3) target bundleno = 3 (0x3), region = 79 }
 0x2b6   :  { %684 = vsyncpa [#allocation3], 1 }
 0x2b7   :  { %686 = vsyncpa [#allocation3 + $0x1], 1 }

</bundles_post_ra>
